<compile_context>
chip_gen: v6e
topology: v6e:2x2x1
jax: 0.10.0
libtpu: 0.0.40
codegen_flags: <defaults>
</compile_context>

<pallas_src>
import functools

import jax
import jax.numpy as jnp
from jax import lax
from jax.experimental import pallas as pl
from jax.experimental.pallas import tpu as pltpu


def _cdiv(a, b):
    return (a + b - 1) // b


def _round_up(x, m):
    return (x + m - 1) // m * m


def _vmem_capacity_bytes():
    """Chip-aware VMEM size; conservative (v7x-sized) fallback."""
    try:
        return int(pltpu.get_tpu_info().vmem_capacity_bytes)
    except Exception:  # not on TPU / older jax
        return 64 * 1024 * 1024


def _scores(text, img):
    """(T, TILE_N) attention scores: contract over D without an explicit img.T."""
    return lax.dot_general(
        text.astype(jnp.bfloat16), img.astype(jnp.bfloat16),
        dimension_numbers=(((1,), (1,)), ((), ())),   # contract D of both operands
        preferred_element_type=jnp.float32,
    )


# --------------------------------------------------------------------------
# Fused fast path: whole image resident in VMEM, single kernel invocation.
# --------------------------------------------------------------------------
def _fused_kernel(alpha_ref, text_ref, img_ref, out_ref, *, num_text):
    img = img_ref[...]                                       # (N, D), loaded once
    s = _scores(text_ref[...], img)                          # (T, N) f32
    m = jnp.max(s, axis=-1, keepdims=True)                   # (T, 1)
    e = jnp.exp(s - m)                                       # (T, N)
    l = jnp.sum(e, axis=-1, keepdims=True)                   # (T, 1)
    # alpha folded into the per-row normalizer; exact divide (HBM-bound anyway).
    inv = alpha_ref[0] * pl.reciprocal(l * jnp.float32(num_text), approx=False)
    spatial = lax.dot_general(                               # mean over T fused on MXU
        e, inv, dimension_numbers=(((0,), (0,)), ((), ())),
        preferred_element_type=jnp.float32)                  # (N, 1)
    out_ref[...] = (img.astype(jnp.float32) * (1.0 + spatial)).astype(out_ref.dtype)


# --------------------------------------------------------------------------
# Streaming path, pass 1: online-softmax stats, 2-way split over cores.
# --------------------------------------------------------------------------
def _stats_kernel(text_ref, img_ref, m_ref, l_ref, *,
                  tile_n, tiles_per_core, n_valid, needs_mask):
    c = pl.program_id(0)                                     # core split (parallel)
    j = pl.program_id(1)                                     # tile within core (arbitrary)

    @pl.when(j == 0)
    def _():
        m_ref[...] = jnp.full_like(m_ref, -jnp.inf)
        l_ref[...] = jnp.zeros_like(l_ref)

    s = _scores(text_ref[...], img_ref[...])                 # (T, TILE_N) f32
    if needs_mask:
        # Mask padded columns of the ragged last tile AND fully mask the
        # clamped duplicate tile (when num_tiles is odd) using the *logical*
        # unclamped tile index -> they never enter max / sum.
        tile_idx = c * tiles_per_core + j
        col = tile_idx * tile_n + lax.broadcasted_iota(jnp.int32, s.shape, 1)
        s = jnp.where(col < n_valid, s, -jnp.inf)

    m_old = m_ref[0]                                         # (T, 1)
    m_new = jnp.maximum(m_old, jnp.max(s, axis=-1, keepdims=True))
    e = jnp.exp(s - m_new)                                   # masked cols -> 0
    l_ref[0] = jnp.exp(m_old - m_new) * l_ref[0] + jnp.sum(e, axis=-1, keepdims=True)
    m_ref[0] = m_new


# --------------------------------------------------------------------------
# Streaming path, pass 2: merge partials, recompute scores, scale, write.
# --------------------------------------------------------------------------
def _apply_kernel(alpha_ref, text_ref, m_ref, l_ref, img_ref, out_ref, *, num_text):
    img = img_ref[...]                                       # (TILE_N, D), loaded once
    s = _scores(text_ref[...], img)                          # (T, TILE_N) f32

    mp = m_ref[...]                                          # (n_cores, T, 1) partials
    lp = l_ref[...]
    m = jnp.max(mp, axis=0)                                  # (T, 1) merged max
    l = jnp.sum(lp * jnp.exp(mp - m), axis=0)                # (T, 1) merged sum

    # Ragged last tile: garbage OOB columns only influence OOB output rows,
    # which are discarded by the masked write below.
    e = jnp.exp(s - m)                                       # (T, TILE_N)
    inv = alpha_ref[0] * pl.reciprocal(l * jnp.float32(num_text), approx=False)
    spatial = lax.dot_general(                               # (TILE_N, 1)
        e, inv, dimension_numbers=(((0,), (0,)), ((), ())),
        preferred_element_type=jnp.float32)
    out_ref[...] = (img.astype(jnp.float32) * (1.0 + spatial)).astype(out_ref.dtype)


def inject_sa(image_feat, text_feat, alpha, *, tile_n=None, force_streaming=False):
    """image_feat: (N, D), text_feat: (T, D), alpha: python / 0-d scalar.

    Output dtype follows image_feat.dtype (f32 or bf16 I/O both supported).
    """
    n, d = image_feat.shape
    t, d_t = text_feat.shape
    assert d == d_t, "embed dims must match"

    alpha_arr = jnp.reshape(jnp.asarray(alpha, jnp.float32), (1,))
    out_dtype = image_feat.dtype
    img_itemsize = jnp.dtype(image_feat.dtype).itemsize
    txt_itemsize = jnp.dtype(text_feat.dtype).itemsize
    vmem_cap = _vmem_capacity_bytes()

    img_bytes = n * d * img_itemsize
    text_bytes = t * d * txt_itemsize
    scores_bytes = t * _round_up(n, 128) * 4
    # image + output + text + (scores / exp / slack) + headroom
    fused_bytes = 2 * img_bytes + text_bytes + 3 * scores_bytes + (1 << 20)

    # ---------------- Fused, image-resident fast path -------------------------
    if (not force_streaming) and fused_bytes <= vmem_cap // 2:
        kern = functools.partial(_fused_kernel, num_text=t)
        return pl.pallas_call(
            kern,
            in_specs=[
                pl.BlockSpec(memory_space=pltpu.MemorySpace.SMEM),   # alpha (1,)
                pl.BlockSpec(memory_space=pltpu.MemorySpace.VMEM),   # text resident
                pl.BlockSpec(memory_space=pltpu.MemorySpace.VMEM),   # image resident
            ],
            out_specs=pl.BlockSpec(memory_space=pltpu.MemorySpace.VMEM),
            out_shape=jax.ShapeDtypeStruct((n, d), out_dtype),
            compiler_params=pltpu.CompilerParams(
                vmem_limit_bytes=int(vmem_cap * 0.85)),
        )(alpha_arr, text_feat, image_feat)

    # ---------------- Streaming two-pass path ---------------------------------
    if tile_n is None:
        target_tile_bytes = 2 << 20                 # ~2 MiB image tile amortizes step cost
        tile_n = (target_tile_bytes // (d * img_itemsize)) // 128 * 128
    tile_n = max(128, min(int(tile_n), _round_up(n, 128), 4096))
    assert tile_n % 128 == 0, "tile_n must be a multiple of 128"

    num_tiles = _cdiv(n, tile_n)
    n_cores = 2 if num_tiles >= 2 else 1            # 2-way split (megacore on v7x)
    tiles_per_core = _cdiv(num_tiles, n_cores)
    # Mask needed for a ragged last tile and/or the clamped duplicate tile.
    needs_mask = (n % tile_n != 0) or (num_tiles % n_cores != 0)

    tile_bytes = tile_n * d * img_itemsize
    # resident text + double-buffered (in + out) tiles + score temporaries + slack
    stream_vmem = text_bytes + 4 * tile_bytes + 4 * t * tile_n * 4 + (2 << 20)
    vmem_limit = min(int(vmem_cap * 0.9), max(stream_vmem, 32 << 20))

    def _img_idx(c, j):
        # Clamp the (possibly) out-of-range duplicate tile of core 1 when
        # num_tiles is odd; its columns are fully -inf masked in the kernel.
        return (jnp.minimum(c * tiles_per_core + j, num_tiles - 1), 0)

    # ---- Pass 1: per-core online-softmax partials (m, l) ----
    stats_kernel = functools.partial(
        _stats_kernel, tile_n=tile_n, tiles_per_core=tiles_per_core,
        n_valid=n, needs_mask=needs_mask)
    m_parts, l_parts = pl.pallas_call(
        stats_kernel,
        grid=(n_cores, tiles_per_core),
        in_specs=[
            pl.BlockSpec((t, d), lambda c, j: (0, 0)),        # text: resident
            pl.BlockSpec((tile_n, d), _img_idx),              # image tile: pipelined
        ],
        out_specs=(
            pl.BlockSpec((1, t, 1), lambda c, j: (c, 0, 0)),  # m partial per core
            pl.BlockSpec((1, t, 1), lambda c, j: (c, 0, 0)),  # l partial per core
        ),
        out_shape=(
            jax.ShapeDtypeStruct((n_cores, t, 1), jnp.float32),
            jax.ShapeDtypeStruct((n_cores, t, 1), jnp.float32),
        ),
        compiler_params=pltpu.CompilerParams(
            dimension_semantics=("parallel", "arbitrary"),
            vmem_limit_bytes=vmem_limit),
    )(text_feat, image_feat)

    # ---- Pass 2: recompute scores per tile, merge partials, scale, write ----
    apply_kernel = functools.partial(_apply_kernel, num_text=t)
    out = pl.pallas_call(
        apply_kernel,
        grid=(num_tiles,),
        in_specs=[
            pl.BlockSpec(memory_space=pltpu.MemorySpace.SMEM),       # alpha (1,)
            pl.BlockSpec((t, d), lambda j: (0, 0)),                  # text: resident
            pl.BlockSpec((n_cores, t, 1), lambda j: (0, 0, 0)),      # m partials
            pl.BlockSpec((n_cores, t, 1), lambda j: (0, 0, 0)),      # l partials
            pl.BlockSpec((tile_n, d), lambda j: (j, 0)),             # image tile
        ],
        out_specs=pl.BlockSpec((tile_n, d), lambda j: (j, 0)),
        out_shape=jax.ShapeDtypeStruct((n, d), out_dtype),           # no pad / no slice
        compiler_params=pltpu.CompilerParams(
            dimension_semantics=("parallel",),                       # megacore-friendly
            vmem_limit_bytes=vmem_limit),
    )(alpha_arr, text_feat, m_parts, l_parts, image_feat)
    return out


if __name__ == "__main__":
    key = jax.random.PRNGKey(0)
    k1, k2, k3 = jax.random.split(key, 3)

    D, T = 128, 8            # D=128 keeps image / output stores lane-dense
    alpha = 1.0              # deterministic init: nn.Parameter(torch.tensor(1.0))

    def reference(img, txt, a):
        scores = txt @ img.T
        weights = jax.nn.softmax(scores, axis=-1)
        spatial = weights.mean(axis=0)
        return img * (1.0 + a * spatial[:, None])

    text_feat = jax.random.normal(k2, (T, D), dtype=jnp.float32)

    # Case 1: fused image-resident fast path (small N*D fits in VMEM).
    N1 = 14 * 16             # 224 flattened spatial tokens
    img1 = jax.random.normal(k1, (N1, D), dtype=jnp.float32)
    out1 = jax.block_until_ready(inject_sa(img1, text_feat, alpha))
    ref1 = reference(img1, text_feat, alpha)
    assert out1.shape == (N1, D)
    err1 = float(jnp.max(jnp.abs(out1 - ref1)))
    assert jnp.allclose(out1, ref1, rtol=2e-2, atol=2e-2), f"fused path err={err1}"

    # Case 2: streaming path, even tile count, ragged last tile (224 % 128 != 0).
    out2 = jax.block_until_ready(
        inject_sa(img1, text_feat, alpha, tile_n=128, force_streaming=True))
    err2 = float(jnp.max(jnp.abs(out2 - ref1)))
    assert jnp.allclose(out2, ref1, rtol=2e-2, atol=2e-2), f"stream path err={err2}"

    # Case 3: streaming path, odd tile count (exercises the clamped duplicate
    # tile of the 2-way core split) plus a ragged last tile.
    N3 = 296
    img3 = jax.random.normal(k3, (N3, D), dtype=jnp.float32)
    out3 = jax.block_until_ready(
        inject_sa(img3, text_feat, alpha, tile_n=128, force_streaming=True))
    ref3 = reference(img3, text_feat, alpha)
    assert out3.shape == (N3, D)
    err3 = float(jnp.max(jnp.abs(out3 - ref3)))
    assert jnp.allclose(out3, ref3, rtol=2e-2, atol=2e-2), f"odd-tile path err={err3}"

    print("KERNEL_OK")
</pallas_src>

<mosaic_0001>
module attributes {stable_mosaic.version = 11 : i64} {
  func.func @_fused_kernel(%arg0: memref<1xf32, #tpu.memory_space<smem>>, %arg1: memref<8x128xf32, #tpu.memory_space<vmem>>, %arg2: memref<224x128xf32, #tpu.memory_space<vmem>>, %arg3: memref<224x128xf32, #tpu.memory_space<vmem>>) attributes {dimension_semantics = [], scalar_prefetch = 0 : i64, scratch_operands = 0 : i64, tpu.core_type = #tpu.core_type<tc>} {
    %c0 = arith.constant 0 : index
    %c0_0 = arith.constant 0 : index
    %0 = vector.load %arg2[%c0, %c0_0] : memref<224x128xf32, #tpu.memory_space<vmem>>, vector<224x128xf32>
    %c0_1 = arith.constant 0 : index
    %c0_2 = arith.constant 0 : index
    %1 = vector.load %arg1[%c0_1, %c0_2] : memref<8x128xf32, #tpu.memory_space<vmem>>, vector<8x128xf32>
    %2 = arith.truncf %1 : vector<8x128xf32> to vector<8x128xbf16>
    %3 = arith.truncf %0 : vector<224x128xf32> to vector<224x128xbf16>
    %cst = arith.constant dense<0.000000e+00> : vector<8x224xf32>
    %4 = tpu.matmul %2, %3, %cst {dimension_numbers = #tpu.dot_dimension_numbers<[1], [1], [0], [0], [0, 0, 1, 0], [], []>} : vector<8x128xbf16>, vector<224x128xbf16>, vector<8x224xf32> -> vector<8x224xf32>
    %cst_3 = arith.constant dense<0xFF800000> : vector<8xf32>
    %5 = vector.multi_reduction <maximumf>, %4, %cst_3 [1] : vector<8x224xf32> to vector<8xf32>
    %6 = vector.shape_cast %5 : vector<8xf32> to vector<8x1xf32>
    %7 = vector.broadcast %6 : vector<8x1xf32> to vector<8x224xf32>
    %8 = arith.subf %4, %7 : vector<8x224xf32>
    %9 = math.exp %8 : vector<8x224xf32>
    %cst_4 = arith.constant dense<0.000000e+00> : vector<8xf32>
    %10 = vector.multi_reduction <add>, %9, %cst_4 [1] : vector<8x224xf32> to vector<8xf32>
    %11 = vector.shape_cast %10 : vector<8xf32> to vector<8x1xf32>
    %c0_5 = arith.constant 0 : index
    %12 = memref.load %arg0[%c0_5] : memref<1xf32, #tpu.memory_space<smem>>
    %cst_6 = arith.constant 8.000000e+00 : f32
    %13 = vector.broadcast %cst_6 : f32 to vector<8x1xf32>
    %14 = arith.mulf %11, %13 : vector<8x1xf32>
    %15 = tpu.reciprocal %14 : vector<8x1xf32> -> vector<8x1xf32>
    %16 = vector.broadcast %12 : f32 to vector<8x1xf32>
    %17 = arith.mulf %16, %15 : vector<8x1xf32>
    %cst_7 = arith.constant dense<0.000000e+00> : vector<224x1xf32>
    %18 = tpu.matmul %9, %17, %cst_7 {dimension_numbers = #tpu.dot_dimension_numbers<[0], [0], [1], [1], [0, 1, 1, 1], [], []>} : vector<8x224xf32>, vector<8x1xf32>, vector<224x1xf32> -> vector<224x1xf32>
    %cst_8 = arith.constant 1.000000e+00 : f32
    %19 = vector.broadcast %cst_8 : f32 to vector<224x1xf32>
    %20 = arith.addf %19, %18 : vector<224x1xf32>
    %21 = vector.broadcast %20 : vector<224x1xf32> to vector<224x128xf32>
    %22 = arith.mulf %0, %21 : vector<224x128xf32>
    %c0_9 = arith.constant 0 : index
    %c0_10 = arith.constant 0 : index
    %23 = vector.load %arg3[%c0_9, %c0_10] : memref<224x128xf32, #tpu.memory_space<vmem>>, vector<224x128xf32>
    tpu.vector_store %arg3[%c0_9, %c0_10], %22 {strides = array<i32>} : memref<224x128xf32, #tpu.memory_space<vmem>>, vector<224x128xf32>,
    return
  }
}

</mosaic_0001>

<bundles_post_ra>
// kernel: tpu_custom_call.1
= control target key start
LH: loop header
LB: loop body
LE: loop exit
PB: predicated region body
PF: predicated region fallthrough
CT: control target
= control target key end

     0   :  { %9 = vsyncpa [#allocation4], 0  ;;  %s1101_s0 = inlined_call_operand.<no memory space> [shape: f32[1], index: 0, kind: input, shape index: {}]   ;;  %s1102_s1 = inlined_call_operand.hbm [shape: f32[8,128], index: 1, kind: input, shape index: {}]   ;;  %s1103_s2 = inlined_call_operand.hbm [shape: f32[224,128], index: 2, kind: input, shape index: {}]   ;;  %s1104_s3 = inlined_call_operand.hbm [shape: f32[224,128], index: 3, kind: output, shape index: {}]  }
   0x1   :  { %10 = vsyncpa [#allocation7], 0 }
   0x2   :  { %11 = vsyncpa [#allocation5], 0  ;;  %s898_s12 = smov [#allocation3]   ;;  %s899_s14 = smov [#allocation6]  }
   0x3   :  { %s20_s13 = sshll.u32 %s898_s12, 4  ;;  %s29_s15 = sshll.u32 %s899_s14, 4  ;;  %s21_s13 = int_to_ptr.vmem [resolvable:$true] %s20_s13  ;;  %s30_s15 = int_to_ptr.vmem [resolvable:$true] %s29_s15 }
   0x4   :  { %s840_s16 = scalar_lea.vmem %s21_s13, 128  ;;  %p845_p1 = scmp.lt.s32.totalorder %s21_s13, %s21_s13 }
   0x5   :  { %p841_p0 = scmp.ne.s32.totalorder %s21_s13, %s840_s16  ;;  %p846_p2 = scmp.lt.s32.totalorder %s840_s16, %s840_s16 }
   0x7   :  { %p847_p3 = por %p846_p2, %p845_p1 }
   0x9   :  { %p848_p4 = pnand %p847_p3, %p841_p0 }
   0xb   :  { %851 = shalt.err (!%p848_p4)
}
   0xc   :  { %23 = dma.hbm_to_vmem [thread:$0]  %s1102_s1, 128, %s21_s13, [#allocation4]  }
   0xd   :  { %s860_s19 = scalar_lea.vmem %s30_s15, 3584  ;;  %p865_p6 = scmp.lt.s32.totalorder %s30_s15, %s30_s15 }
   0xe   :  { %p861_p5 = scmp.ne.s32.totalorder %s30_s15, %s860_s19  ;;  %p866_p7 = scmp.lt.s32.totalorder %s860_s19, %s860_s19 }
  0x10   :  { %p867_p8 = por %p866_p7, %p865_p6 }
  0x12   :  { %p868_p9 = pnand %p867_p8, %p861_p5 }
  0x14   :  { %871 = shalt.err (!%p868_p9)
}
  0x15   :  { %s900_s20 = smov 128   ;;  %s901_s21 = smov 8  }
  0x16   :  { %35 = dma.hbm_to_vmem [thread:$0]  %s1103_s2, 3584, %s30_s15, [#allocation7], %s900_s20, %s900_s20, %s901_s21  }
  0x17   :  { %892 = dma.done.wait [#allocation4], 128  }
  0x18   :  { %893 = vsyncadd [#allocation4], 4294967168 }
  0x19   :  { %894 = dma.done.wait [#allocation7], 3584  }
  0x1a   :  { %895 = vsyncadd [#allocation7], 4294963712  ;;  %v902_v0 = vmov 0   ;;  %v936_v1 = vld [vmem:[#allocation6 + $0x70] sm:$0xff]  ;;  %v938_v2 = vld [vmem:[#allocation6 + $0x78] sm:$0xff]  ;;  %vm128_vm0 = vcmask 785408  }
  0x1b   :  { %87 = vmatprep.subr.bf16.mxu0 %v902_v0  ;;  %119 = vmatprep.mubr.bf16.mxu0 %v902_v0  ;;  %v80_v3 = vpack.c.bf16 %v938_v2, %v936_v1  ;;  %v943_v4 = vld [vmem:[#allocation6 + $0x60] sm:$0xff]  ;;  %v945_v5 = vld [vmem:[#allocation6 + $0x68] sm:$0xff]  ;;  %v950_v7 = vld [vmem:[#allocation6 + $0x50] sm:$0xff]  ;;  %vm212_vm1 = vcmask 64512  }
  0x1c   :  { %824 = vset.pattern.permute.xlu0 %v902_v0  ;;  %v79_v6 = vpack.c.bf16 %v945_v5, %v943_v4  ;;  %v952_v8 = vld [vmem:[#allocation6 + $0x58] sm:$0xff]  ;;  %v957_v10 = vld [vmem:[#allocation6 + $0x40] sm:$0xff]  ;;  %v959_v11 = vld [vmem:[#allocation6 + $0x48] sm:$0xff] }
  0x1d   :  { %88 = vmatpush1.bf16.xpose.msra.mxu0 %v80_v3  ;;  %v78_v9 = vpack.c.bf16 %v952_v8, %v950_v7  ;;  %v77_v12 = vpack.c.bf16 %v959_v11, %v957_v10  ;;  %v964_v13 = vld [vmem:[#allocation6 + $0x30] sm:$0xff]  ;;  %v966_v14 = vld [vmem:[#allocation6 + $0x38] sm:$0xff]  ;;  %v971_v16 = vld [vmem:[#allocation6 + $0x20] sm:$0xff] }
  0x1e   :  { %89 = vmatprep.subr.bf16.mxu0 %v902_v0  ;;  %v76_v15 = vpack.c.bf16 %v966_v14, %v964_v13  ;;  %v973_v17 = vld [vmem:[#allocation6 + $0x28] sm:$0xff]  ;;  %v978_v19 = vld [vmem:[#allocation6 + $0x10] sm:$0xff]  ;;  %v980_v20 = vld [vmem:[#allocation6 + $0x18] sm:$0xff] }
  0x1f   :  { %v75_v18 = vpack.c.bf16 %v973_v17, %v971_v16  ;;  %v74_v21 = vpack.c.bf16 %v980_v20, %v978_v19  ;;  %v985_v22 = vld [vmem:[#allocation6] sm:$0xff]  ;;  %v987_v23 = vld [vmem:[#allocation6 + $0x8] sm:$0xff]  ;;  %v992_v25 = vld [vmem:[#allocation6 + $0xd0] sm:$0xff] }
  0x20   :  { %v73_v24 = vpack.c.bf16 %v987_v23, %v985_v22  ;;  %v994_v26 = vld [vmem:[#allocation6 + $0xd8] sm:$0xff]  ;;  %v999_v28 = vld [vmem:[#allocation6 + $0xc0] sm:$0xff]  ;;  %v1001_v29 = vld [vmem:[#allocation6 + $0xc8] sm:$0xff] }
  0x21   :  { %v86_v27 = vpack.c.bf16 %v994_v26, %v992_v25  ;;  %v85_v30 = vpack.c.bf16 %v1001_v29, %v999_v28  ;;  %v1006_v31 = vld [vmem:[#allocation6 + $0xb0] sm:$0xff]  ;;  %v1008_v32 = vld [vmem:[#allocation6 + $0xb8] sm:$0xff]  ;;  %v1013_v34 = vld [vmem:[#allocation6 + $0xa0] sm:$0xff] }
  0x22   :  { %v84_v33 = vpack.c.bf16 %v1008_v32, %v1006_v31  ;;  %v1015_v35 = vld [vmem:[#allocation6 + $0xa8] sm:$0xff]  ;;  %v1020_v37 = vld [vmem:[#allocation6 + $0x90] sm:$0xff]  ;;  %v1022_v38 = vld [vmem:[#allocation6 + $0x98] sm:$0xff] }
  0x23   :  { %v83_v36 = vpack.c.bf16 %v1015_v35, %v1013_v34  ;;  %v82_v39 = vpack.c.bf16 %v1022_v38, %v1020_v37  ;;  %v1027_v40 = vld [vmem:[#allocation6 + $0x80] sm:$0xff]  ;;  %v1029_v41 = vld [vmem:[#allocation6 + $0x88] sm:$0xff]  ;;  %v71_v43 = vld [vmem:[#allocation3] sm:$0xff] }
  0x24   :  { %v81_v42 = vpack.c.bf16 %v1029_v41, %v1027_v40  ;;  %v72_v44 = vpack.c.bf16 %v71_v43, %v71_v43 }
  0x25   :  { %90 = vmatpush1.bf16.xpose.msra.mxu0 %v79_v6 }
  0x26   :  { %91 = vmatprep.subr.bf16.mxu0 %v902_v0 }
  0x2d   :  { %92 = vmatpush1.bf16.xpose.msra.mxu0 %v78_v9 }
  0x2e   :  { %93 = vmatprep.subr.bf16.mxu0 %v902_v0 }
  0x35   :  { %94 = vmatpush1.bf16.xpose.msra.mxu0 %v77_v12 }
  0x36   :  { %95 = vmatprep.subr.bf16.mxu0 %v902_v0 }
  0x3d   :  { %96 = vmatpush1.bf16.xpose.msra.mxu0 %v76_v15 }
  0x3e   :  { %97 = vmatprep.subr.bf16.mxu0 %v902_v0 }
  0x45   :  { %98 = vmatpush1.bf16.xpose.msra.mxu0 %v75_v18 }
  0x46   :  { %99 = vmatprep.subr.bf16.mxu0 %v902_v0 }
  0x4d   :  { %100 = vmatpush1.bf16.xpose.msra.mxu0 %v74_v21  ;;  %v146_v21 = vstv %s1101_s0  ;;  %s903_s0 = smov [#allocation8]  }
  0x4e   :  { %101 = vmatprep.subr.bf16.mxu0 %v902_v0  ;;  %s703_s24 = sshll.u32 %s903_s0, 4  ;;  %s704_s24 = int_to_ptr.vmem [resolvable:$true] %s703_s24 }
  0x4f   :  { %s872_s25 = scalar_lea.vmem %s704_s24, 3584  ;;  %p877_p11 = scmp.lt.s32.totalorder %s704_s24, %s704_s24 }
  0x50   :  { %p873_p10 = scmp.ne.s32.totalorder %s704_s24, %s872_s25  ;;  %p878_p12 = scmp.lt.s32.totalorder %s872_s25, %s872_s25 }
  0x52   :  { %p879_p13 = por %p878_p12, %p877_p11 }
  0x54   :  { %p880_p0 = pnand %p879_p13, %p873_p10 }
  0x55   :  { %102 = vmatpush1.bf16.xpose.msra.mxu0 %v73_v24 }
  0x56   :  { %107 = vmatprep.subr.bf16.mxu0 %v902_v0 }
  0x5d   :  { %108 = vmatpush2.bf16.xpose.msra.mxu0 %v86_v27 }
  0x5e   :  { %109 = vmatprep.subr.bf16.mxu0 %v902_v0 }
  0x65   :  { %110 = vmatpush2.bf16.xpose.msra.mxu0 %v85_v30 }
  0x66   :  { %111 = vmatprep.subr.bf16.mxu0 %v902_v0 }
  0x6d   :  { %112 = vmatpush2.bf16.xpose.msra.mxu0 %v84_v33 }
  0x6e   :  { %113 = vmatprep.subr.bf16.mxu0 %v902_v0 }
  0x75   :  { %114 = vmatpush2.bf16.xpose.msra.mxu0 %v83_v36 }
  0x76   :  { %115 = vmatprep.subr.bf16.mxu0 %v902_v0 }
  0x7d   :  { %116 = vmatpush2.bf16.xpose.msra.mxu0 %v82_v39 }
  0x7e   :  { %117 = vmatprep.subr.bf16.mxu0 %v902_v0 }
  0x85   :  { %118 = vmatpush2.bf16.xpose.msra.mxu0 %v81_v42 }
  0x8c   :  { %120 = vmatmul.mubr.bf16.vlgmr.msra.gmra.mxu0 %v72_v44 }
 0x14c   :  { %v121_v45 = vpop.f32.mrf.mxu0 }
 0x14e   :  { %v123_v46 = vpop.f32.mrf.mxu0 }
 0x14f   :  { %v129_v47 = vsel %vm128_vm0, %v123_v46, -inf }
 0x150   :  { %v125_v48 = vpop.f32.mrf.mxu0  ;;  %v130_v49 = vmax.f32 %v121_v45, %v129_v47 }
 0x152   :  { %131 = vmax.xlane.f32.xlu0 %v130_v49  ;;  %v126_v50 = vpop.f32.mrf.mxu0 }
 0x1db   :  { %v132_v51 = vpop.xlane.xlu0 %131 }
 0x1dc   :  { %v133_v52 = vsub.f32 %v121_v45, %v132_v51  ;;  %v134_v53 = vsub.f32 %v123_v46, %v132_v51 }
 0x1de   :  { %v135_v54 = vmul.f32 1.442695, %v133_v52  ;;  %v137_v55 = vmul.f32 1.442695, %v134_v53 }
 0x1e0   :  { %826 = vpow2.f32 %v135_v54 }
 0x1e1   :  { %828 = vpow2.f32 %v137_v55 }
 0x1ed   :  { %v827_v56 = vpop.eup %826 }
 0x1ee   :  { %v829_v57 = vpop.eup %828  ;;  %148 = vxpose.xlu1.b32.start.end [1/1] (short) %v827_v56, 128 }
 0x1ef   :  { %v139_v58 = vsel %vm128_vm0, %v829_v57, 0.0 }
 0x1f0   :  { %v140_v59 = vadd.f32 %v827_v56, %v139_v58 }
 0x1f2   :  { %141 = vadd.xlane.f32.xlu0 %v140_v59 }
 0x22b   :  { %180 = vxpose.xlu1.b32.start.end [1/1] (short) (narrow) %v829_v57, 96 }
 0x249   :  { %825 = vset.pattern.permute.xlu1 %v902_v0 }
 0x26a   :  { %v164_v60 = vpop.trf.xlu1 }
 0x26b   :  { %775 = vmatprep.mubr.msk.f32.mxu1 %vm212_vm1, %v164_v60 }
 0x26e   :  { %v165_v61 = vpop.trf.xlu1 }
 0x272   :  { %v166_v62 = vpop.trf.xlu1 }
 0x276   :  { %v167_v63 = vpop.trf.xlu1 }
 0x27a   :  { %v168_v3 = vpop.trf.xlu1 }
 0x27b   :  { %v142_v6 = vpop.xlane.xlu0 %141 }
 0x27c   :  { %v144_v9 = vmul.f32 8.0, %v142_v6 }
 0x27e   :  { %830 = vrcp.f32 %v144_v9  ;;  %v169_v12 = vpop.trf.xlu1 }
 0x282   :  { %v170_v15 = vpop.trf.xlu1 }
 0x286   :  { %v171_v18 = vpop.trf.xlu1 }
 0x28a   :  { %v172_v24 = vpop.trf.xlu1 }
 0x28b   :  { %v831_v0 = vpop.eup %830 }
 0x28c   :  { %v147_v27 = vmul.f32 %v831_v0, %v146_v21 }
 0x28e   :  { %773 = vmatprep.subr.mxu1 %v147_v27  ;;  %v173_v30 = vpop.trf.xlu1 }
 0x28f   :  { %774 = vmatpush3.msra.mxu1 %v147_v27 }
 0x290   :  { %776 = vmatmul.mubr.msk.f32.vlgmr.msra.gmra.mxu1 %vm212_vm1, %v165_v61 }
 0x291   :  { %778 = vmatprep.mubr.msk.f32.mxu1 %vm212_vm1, %v166_v62 }
 0x292   :  { %v174_v33 = vpop.trf.xlu1 }
 0x294   :  { %779 = vmatmul.mubr.msk.f32.gmra.mxu1 %vm212_vm1, %v167_v63 }
 0x295   :  { %781 = vmatprep.mubr.msk.f32.mxu1 %vm212_vm1, %v168_v3 }
 0x296   :  { %v175_v36 = vpop.trf.xlu1 }
 0x298   :  { %782 = vmatmul.mubr.msk.f32.gmra.mxu1 %vm212_vm1, %v169_v12 }
 0x299   :  { %784 = vmatprep.mubr.msk.f32.mxu1 %vm212_vm1, %v170_v15 }
 0x29a   :  { %v176_v39 = vpop.trf.xlu1 }
 0x29c   :  { %785 = vmatmul.mubr.msk.f32.gmra.mxu1 %vm212_vm1, %v171_v18 }
 0x29d   :  { %787 = vmatprep.mubr.msk.f32.mxu1 %vm212_vm1, %v172_v24 }
 0x29e   :  { %v177_v42 = vpop.trf.xlu1 }
 0x2a0   :  { %788 = vmatmul.mubr.msk.f32.gmra.mxu1 %vm212_vm1, %v173_v30 }
 0x2a1   :  { %790 = vmatprep.mubr.msk.f32.mxu1 %vm212_vm1, %v174_v33 }
 0x2a2   :  { %v178_v43 = vpop.trf.xlu1 }
 0x2a4   :  { %791 = vmatmul.mubr.msk.f32.gmra.mxu1 %vm212_vm1, %v175_v36 }
 0x2a5   :  { %793 = vmatprep.mubr.msk.f32.mxu1 %vm212_vm1, %v176_v39 }
 0x2a6   :  { %v179_v44 = vpop.trf.xlu1 }
 0x2a8   :  { %794 = vmatmul.mubr.msk.f32.gmra.mxu1 %vm212_vm1, %v177_v42 }
 0x2a9   :  { %796 = vmatprep.mubr.msk.f32.mxu1 %vm212_vm1, %v178_v43 }
 0x2aa   :  { %v196_v45 = vpop.trf.xlu1 }
 0x2ac   :  { %797 = vmatmul.mubr.msk.f32.gmra.mxu1 %vm212_vm1, %v179_v44 }
 0x2ad   :  { %799 = vmatprep.mubr.msk.f32.mxu1 %vm212_vm1, %v196_v45 }
 0x2ae   :  { %v197_v46 = vpop.trf.xlu1 }
 0x2b0   :  { %800 = vmatmul.mubr.msk.f32.gmra.mxu1 %vm212_vm1, %v197_v46 }
 0x2b2   :  { %v198_v47 = vpop.trf.xlu1 }
 0x2b3   :  { %802 = vmatprep.mubr.msk.f32.mxu1 %vm212_vm1, %v198_v47 }
 0x2b6   :  { %v199_v48 = vpop.trf.xlu1 }
 0x2b7   :  { %803 = vmatmul.mubr.msk.f32.gmra.mxu1 %vm212_vm1, %v199_v48 }
 0x2ba   :  { %v200_v49 = vpop.trf.xlu1 }
 0x2bb   :  { %805 = vmatprep.mubr.msk.f32.mxu1 %vm212_vm1, %v200_v49 }
 0x2be   :  { %v201_v50 = vpop.trf.xlu1 }
 0x2bf   :  { %806 = vmatmul.mubr.msk.f32.gmra.mxu1 %vm212_vm1, %v201_v50 }
 0x2c2   :  { %v202_v51 = vpop.trf.xlu1 }
 0x2c3   :  { %808 = vmatprep.mubr.msk.f32.mxu1 %vm212_vm1, %v202_v51 }
 0x2c6   :  { %v203_v52 = vpop.trf.xlu1 }
 0x2c7   :  { %809 = vmatmul.mubr.msk.f32.gmra.mxu1 %vm212_vm1, %v203_v52 }
 0x2ca   :  { %v204_v53 = vpop.trf.xlu1 }
 0x2cb   :  { %811 = vmatprep.mubr.msk.f32.mxu1 %vm212_vm1, %v204_v53 }
 0x2ce   :  { %v205_v54 = vpop.trf.xlu1 }
 0x2cf   :  { %812 = vmatmul.mubr.msk.f32.gmra.mxu1 %vm212_vm1, %v205_v54 }
 0x2d2   :  { %v206_v55 = vpop.trf.xlu1 }
 0x2d3   :  { %814 = vmatprep.mubr.msk.f32.mxu1 %vm212_vm1, %v206_v55 }
 0x2d6   :  { %v207_v56 = vpop.trf.xlu1 }
 0x2d7   :  { %815 = vmatmul.mubr.msk.f32.gmra.mxu1 %vm212_vm1, %v207_v56 }
 0x350   :  { %v777_v57 = vpop.f32.mrf.mxu1 }
 0x351   :  { %v369_v58 = vadd.f32 1.0, %v777_v57 }
 0x352   :  { %v363_v59 = vpop.f32.mrf.mxu1 }
 0x353   :  { %509 = vperm.xlu0 %824, %v369_v58   ;;  %v364_v61 = vadd.f32 1.0, %v363_v59 }
 0x354   :  { %v780_v60 = vpop.f32.mrf.mxu1 }
 0x355   :  { %v379_v3 = vadd.f32 1.0, %v780_v60 }
 0x356   :  { %v373_v62 = vpop.f32.mrf.mxu1 }
 0x357   :  { %504 = vperm.xlu0 %824, %v364_v61   ;;  %v374_v15 = vadd.f32 1.0, %v373_v62 }
 0x358   :  { %v783_v63 = vpop.f32.mrf.mxu1 }
 0x359   :  { %v389_v6 = vadd.f32 1.0, %v783_v63 }
 0x35a   :  { %v383_v9 = vpop.f32.mrf.mxu1 }
 0x35b   :  { %529 = vperm.xlu1 %825, %v389_v6   ;;  %519 = vperm.xlu0 %824, %v379_v3   ;;  %v384_v24 = vadd.f32 1.0, %v383_v9 }
 0x35c   :  { %v786_v12 = vpop.f32.mrf.mxu1 }
 0x35d   :  { %v399_v27 = vadd.f32 1.0, %v786_v12 }
 0x35e   :  { %v393_v18 = vpop.f32.mrf.mxu1 }
 0x35f   :  { %514 = vperm.xlu0 %824, %v374_v15   ;;  %v394_v33 = vadd.f32 1.0, %v393_v18 }
 0x360   :  { %v789_v21 = vpop.f32.mrf.mxu1 }
 0x361   :  { %v409_v42 = vadd.f32 1.0, %v789_v21 }
 0x362   :  { %v403_v0 = vpop.f32.mrf.mxu1 }
 0x363   :  { %524 = vperm.xlu0 %824, %v384_v24   ;;  %v404_v44 = vadd.f32 1.0, %v403_v0 }
 0x364   :  { %v792_v30 = vpop.f32.mrf.mxu1 }
 0x365   :  { %v419_v46 = vadd.f32 1.0, %v792_v30 }
 0x366   :  { %v413_v36 = vpop.f32.mrf.mxu1 }
 0x367   :  { %539 = vperm.xlu0 %824, %v399_v27   ;;  %v414_v49 = vadd.f32 1.0, %v413_v36 }
 0x368   :  { %v795_v39 = vpop.f32.mrf.mxu1 }
 0x369   :  { %v429_v51 = vadd.f32 1.0, %v795_v39 }
 0x36a   :  { %v423_v43 = vpop.f32.mrf.mxu1 }
 0x36b   :  { %534 = vperm.xlu0 %824, %v394_v33   ;;  %v424_v53 = vadd.f32 1.0, %v423_v43 }
 0x36c   :  { %v798_v45 = vpop.f32.mrf.mxu1 }
 0x36d   :  { %v439_v56 = vadd.f32 1.0, %v798_v45 }
 0x36e   :  { %v433_v47 = vpop.f32.mrf.mxu1 }
 0x36f   :  { %549 = vperm.xlu0 %824, %v409_v42   ;;  %v434_v58 = vadd.f32 1.0, %v433_v47 }
 0x370   :  { %v801_v48 = vpop.f32.mrf.mxu1 }
 0x371   :  { %v449_v60 = vadd.f32 1.0, %v801_v48 }
 0x372   :  { %v443_v50 = vpop.f32.mrf.mxu1 }
 0x373   :  { %544 = vperm.xlu0 %824, %v404_v44   ;;  %v444_v63 = vadd.f32 1.0, %v443_v50 }
 0x377   :  { %559 = vperm.xlu0 %824, %v419_v46   ;;  %v804_v52 = vpop.f32.mrf.mxu1 }
 0x378   :  { %v459_v9 = vadd.f32 1.0, %v804_v52 }
 0x379   :  { %v453_v54 = vpop.f32.mrf.mxu1 }
 0x37a   :  { %v454_v15 = vadd.f32 1.0, %v453_v54 }
 0x37b   :  { %554 = vperm.xlu0 %824, %v414_v49  }
 0x37f   :  { %569 = vperm.xlu0 %824, %v429_v51   ;;  %v807_v55 = vpop.f32.mrf.mxu1 }
 0x380   :  { %v469_v24 = vadd.f32 1.0, %v807_v55 }
 0x381   :  { %v463_v57 = vpop.f32.mrf.mxu1 }
 0x382   :  { %v464_v0 = vadd.f32 1.0, %v463_v57 }
 0x383   :  { %564 = vperm.xlu0 %824, %v424_v53  }
 0x387   :  { %579 = vperm.xlu0 %824, %v439_v56   ;;  %v810_v59 = vpop.f32.mrf.mxu1 }
 0x388   :  { %v479_v27 = vadd.f32 1.0, %v810_v59 }
 0x389   :  { %v473_v61 = vpop.f32.mrf.mxu1 }
 0x38a   :  { %v474_v30 = vadd.f32 1.0, %v473_v61 }
 0x38b   :  { %574 = vperm.xlu0 %824, %v434_v58  }
 0x38f   :  { %589 = vperm.xlu0 %824, %v449_v60   ;;  %v813_v62 = vpop.f32.mrf.mxu1 }
 0x390   :  { %v489_v33 = vadd.f32 1.0, %v813_v62 }
 0x391   :  { %v483_v3 = vpop.f32.mrf.mxu1 }
 0x392   :  { %v484_v6 = vadd.f32 1.0, %v483_v3 }
 0x393   :  { %584 = vperm.xlu0 %824, %v444_v63  }
 0x394   :  { %624 = vperm.xlu1 %825, %v484_v6  }
 0x397   :  { %599 = vperm.xlu0 %824, %v459_v9   ;;  %v816_v12 = vpop.f32.mrf.mxu1 }
 0x398   :  { %v499_v36 = vadd.f32 1.0, %v816_v12 }
 0x399   :  { %v493_v18 = vpop.f32.mrf.mxu1 }
 0x39a   :  { %v494_v21 = vadd.f32 1.0, %v493_v18 }
 0x39b   :  { %594 = vperm.xlu0 %824, %v454_v15  }
 0x39c   :  { %634 = vperm.xlu1 %825, %v494_v21  }
 0x39f   :  { %609 = vperm.xlu0 %824, %v469_v24  }
 0x3a3   :  { %604 = vperm.xlu0 %824, %v464_v0  }
 0x3a7   :  { %619 = vperm.xlu0 %824, %v479_v27  }
 0x3ab   :  { %614 = vperm.xlu0 %824, %v474_v30  }
 0x3af   :  { %629 = vperm.xlu0 %824, %v489_v33  }
 0x3b3   :  { %639 = vperm.xlu0 %824, %v499_v36  }
 0x3ce   :  { %v510_v39 = vpop.permute.xlu0 %509 }
 0x3cf   :  { %v643_v42 = vmul.f32 %v510_v39, %v987_v23 }
 0x3d1   :  { %671 = vst [vmem:[#allocation8 + $0x8] sm:$0xff] %v643_v42 }
 0x3d2   :  { %v505_v43 = vpop.permute.xlu0 %504 }
 0x3d3   :  { %v642_v44 = vmul.f32 %v505_v43, %v985_v22 }
 0x3d5   :  { %670 = vst [vmem:[#allocation8] sm:$0xff] %v642_v44 }
 0x3d6   :  { %v530_v45 = vpop.permute.xlu1 %529  ;;  %v520_v46 = vpop.permute.xlu0 %519 }
 0x3d7   :  { %v647_v47 = vmul.f32 %v530_v45, %v973_v17  ;;  %v645_v48 = vmul.f32 %v520_v46, %v980_v20 }
 0x3d9   :  { %675 = vst [vmem:[#allocation8 + $0x28] sm:$0xff] %v647_v47  ;;  %673 = vst [vmem:[#allocation8 + $0x18] sm:$0xff] %v645_v48 }
 0x3da   :  { %v515_v49 = vpop.permute.xlu0 %514 }
 0x3db   :  { %v644_v50 = vmul.f32 %v515_v49, %v978_v19 }
 0x3dd   :  { %672 = vst [vmem:[#allocation8 + $0x10] sm:$0xff] %v644_v50 }
 0x3de   :  { %v525_v51 = vpop.permute.xlu0 %524 }
 0x3df   :  { %v646_v23 = vmul.f32 %v525_v51, %v971_v16 }
 0x3e1   :  { %674 = vst [vmem:[#allocation8 + $0x20] sm:$0xff] %v646_v23 }
 0x3e2   :  { %v540_v52 = vpop.permute.xlu0 %539 }
 0x3e3   :  { %v649_v22 = vmul.f32 %v540_v52, %v966_v14 }
 0x3e5   :  { %677 = vst [vmem:[#allocation8 + $0x38] sm:$0xff] %v649_v22 }
 0x3e6   :  { %v535_v53 = vpop.permute.xlu0 %534 }
 0x3e7   :  { %v648_v54 = vmul.f32 %v535_v53, %v964_v13 }
 0x3e9   :  { %676 = vst [vmem:[#allocation8 + $0x30] sm:$0xff] %v648_v54 }
 0x3ea   :  { %v550_v17 = vpop.permute.xlu0 %549 }
 0x3eb   :  { %v651_v20 = vmul.f32 %v550_v17, %v959_v11 }
 0x3ed   :  { %679 = vst [vmem:[#allocation8 + $0x48] sm:$0xff] %v651_v20 }
 0x3ee   :  { %v545_v55 = vpop.permute.xlu0 %544 }
 0x3ef   :  { %v650_v19 = vmul.f32 %v545_v55, %v957_v10 }
 0x3f1   :  { %678 = vst [vmem:[#allocation8 + $0x40] sm:$0xff] %v650_v19 }
 0x3f2   :  { %v560_v56 = vpop.permute.xlu0 %559 }
 0x3f3   :  { %v653_v16 = vmul.f32 %v560_v56, %v952_v8 }
 0x3f5   :  { %681 = vst [vmem:[#allocation8 + $0x58] sm:$0xff] %v653_v16 }
 0x3f6   :  { %v555_v57 = vpop.permute.xlu0 %554 }
 0x3f7   :  { %v652_v14 = vmul.f32 %v555_v57, %v950_v7 }
 0x3f9   :  { %680 = vst [vmem:[#allocation8 + $0x50] sm:$0xff] %v652_v14 }
 0x3fa   :  { %v570_v58 = vpop.permute.xlu0 %569 }
 0x3fb   :  { %v655_v13 = vmul.f32 %v570_v58, %v945_v5 }
 0x3fd   :  { %683 = vst [vmem:[#allocation8 + $0x68] sm:$0xff] %v655_v13 }
 0x3fe   :  { %v565_v59 = vpop.permute.xlu0 %564 }
 0x3ff   :  { %v654_v11 = vmul.f32 %v565_v59, %v943_v4 }
 0x401   :  { %682 = vst [vmem:[#allocation8 + $0x60] sm:$0xff] %v654_v11 }
 0x402   :  { %v580_v60 = vpop.permute.xlu0 %579 }
 0x403   :  { %v657_v10 = vmul.f32 %v580_v60, %v938_v2 }
 0x405   :  { %685 = vst [vmem:[#allocation8 + $0x78] sm:$0xff] %v657_v10 }
 0x406   :  { %v575_v61 = vpop.permute.xlu0 %574 }
 0x407   :  { %v656_v8 = vmul.f32 %v575_v61, %v936_v1 }
 0x409   :  { %684 = vst [vmem:[#allocation8 + $0x70] sm:$0xff] %v656_v8 }
 0x40a   :  { %v590_v62 = vpop.permute.xlu0 %589 }
 0x40b   :  { %v659_v7 = vmul.f32 %v590_v62, %v1029_v41 }
 0x40d   :  { %687 = vst [vmem:[#allocation8 + $0x88] sm:$0xff] %v659_v7 }
 0x40e   :  { %v585_v63 = vpop.permute.xlu0 %584 }
 0x40f   :  { %v658_v5 = vmul.f32 %v585_v63, %v1027_v40  ;;  %v625_v3 = vpop.permute.xlu1 %624 }
 0x410   :  { %v666_v6 = vmul.f32 %v625_v3, %v999_v28 }
 0x411   :  { %686 = vst [vmem:[#allocation8 + $0x80] sm:$0xff] %v658_v5 }
 0x412   :  { %v600_v4 = vpop.permute.xlu0 %599  ;;  %694 = vst [vmem:[#allocation8 + $0xc0] sm:$0xff] %v666_v6 }
 0x413   :  { %v661_v2 = vmul.f32 %v600_v4, %v1022_v38 }
 0x415   :  { %689 = vst [vmem:[#allocation8 + $0x98] sm:$0xff] %v661_v2 }
 0x416   :  { %v595_v9 = vpop.permute.xlu0 %594 }
 0x417   :  { %v660_v1 = vmul.f32 %v595_v9, %v1020_v37  ;;  %v635_v12 = vpop.permute.xlu1 %634 }
 0x418   :  { %v668_v15 = vmul.f32 %v635_v12, %v992_v25 }
 0x419   :  { %688 = vst [vmem:[#allocation8 + $0x90] sm:$0xff] %v660_v1 }
 0x41a   :  { %v610_v41 = vpop.permute.xlu0 %609  ;;  %696 = vst [vmem:[#allocation8 + $0xd0] sm:$0xff] %v668_v15 }
 0x41b   :  { %v663_v40 = vmul.f32 %v610_v41, %v1015_v35 }
 0x41d   :  { %691 = vst [vmem:[#allocation8 + $0xa8] sm:$0xff] %v663_v40 }
 0x41e   :  { %v605_v18 = vpop.permute.xlu0 %604 }
 0x41f   :  { %v662_v28 = vmul.f32 %v605_v18, %v1013_v34 }
 0x421   :  { %690 = vst [vmem:[#allocation8 + $0xa0] sm:$0xff] %v662_v28 }
 0x422   :  { %v620_v21 = vpop.permute.xlu0 %619 }
 0x423   :  { %v665_v38 = vmul.f32 %v620_v21, %v1008_v32 }
 0x425   :  { %693 = vst [vmem:[#allocation8 + $0xb8] sm:$0xff] %v665_v38 }
 0x426   :  { %v615_v24 = vpop.permute.xlu0 %614 }
 0x427   :  { %v664_v37 = vmul.f32 %v615_v24, %v1006_v31 }
 0x429   :  { %692 = vst [vmem:[#allocation8 + $0xb0] sm:$0xff] %v664_v37 }
 0x42a   :  { %v630_v0 = vpop.permute.xlu0 %629 }
 0x42b   :  { %v667_v25 = vmul.f32 %v630_v0, %v1001_v29 }
 0x42d   :  { %695 = vst [vmem:[#allocation8 + $0xc8] sm:$0xff] %v667_v25 }
 0x42e   :  { %v640_v35 = vpop.permute.xlu0 %639 }
 0x42f   :  { %v669_v27 = vmul.f32 %v640_v35, %v994_v26 }
 0x431   :  { %697 = vst [vmem:[#allocation8 + $0xd8] sm:$0xff] %v669_v27 }
 0x432   :  { %883 = shalt.err (!%p880_p0)
}
 0x433   :  { %709 = dma.vmem_to_hbm [thread:$0]  %s704_s24, 3584, %s1104_s3, [#allocation5], %s900_s20, %s900_s20, %s901_s21  }
 0x434   :  { %896 = dma.done.wait [#allocation5], 3584  }
 0x435   :  { %897 = vsyncadd [#allocation5], 4294963712 }
 0x436   :  { %713 = vsyncpa [#allocation4], 1 }
 0x437   :  { %714 = vsyncpa [#allocation7], 1 }
 0x438   :  { %715 = vsyncpa [#allocation5], 1 }

</bundles_post_ra>
